<compile_context>
chip_gen: v7x
topology: tpu7x:2x2x1
jax: 0.10.0
libtpu: 0.0.40
codegen_flags: <defaults>
</compile_context>

<pallas_src>
import math

import jax
import jax.numpy as jnp
from jax.experimental import pallas as pl
from jax.experimental.pallas import tpu as pltpu


def _concat_kernel(*refs):
    """refs = (*input_refs, out_ref); copy each input at its static offset."""
    *in_refs, o_ref = refs
    off = 0
    if len(o_ref.shape) == 2:
        # Flat path: blocks (To, C_i*inner) / (To, c_total*inner); lane offsets.
        for x_ref in in_refs:
            w = x_ref.shape[1]
            o_ref[:, off:off + w] = x_ref[...]
            off += w
    else:
        # Tiled path: blocks (1, C_i, Ti) / (1, c_total, Ti); sublane offsets.
        for x_ref in in_refs:
            c = x_ref.shape[1]
            o_ref[:, off:off + c, :] = x_ref[...]
            off += c


def _vmem_limit_bytes():
    """Generation-aware scoped-VMEM limit (headroom below physical)."""
    phys = 128 * 1024 * 1024
    try:
        phys = int(pltpu.get_tpu_info().vmem_capacity_bytes)
    except Exception:
        pass
    # 3/4 of physical, capped at 64 MiB:
    #   v5e/v6e (128 MiB physical) -> 64 MiB;  v7x (64 MiB/TC) -> 48 MiB.
    return int(min(phys * 3 // 4, 64 * 1024 * 1024))


def _round_down(x, m):
    return max((x // m) * m, 0)


def _pick_outer_tile(outer, row_bytes, block_budget):
    """Largest outer tile whose output block fits `block_budget` bytes."""
    to = max(1, block_budget // max(row_bytes, 1))
    to = min(to, outer)
    if to >= outer and outer >= 16:
        # Keep at least two grid steps so both v7x TensorCores get work.
        to = -(-outer // 2)
    if 8 <= to < outer:
        to = (to // 8) * 8          # sublane-aligned outer blocks
    return max(int(to), 1)


def concat(xs, dimension=1, *, _block_budget_bytes=None):
    """Pallas equivalent of torch.cat(xs, dim=dimension) for same-dtype arrays."""
    xs = list(xs)
    assert len(xs) >= 1
    nd = xs[0].ndim
    d = dimension % nd
    dtype = xs[0].dtype
    for x in xs:
        assert x.dtype == dtype, "all inputs must share a dtype"
        assert x.ndim == nd
        assert x.shape[:d] == xs[0].shape[:d]
        assert x.shape[d + 1:] == xs[0].shape[d + 1:]

    # Zero-width inputs contribute nothing; drop them (keep one if all empty).
    xs = [x for x in xs if x.shape[d] > 0] or xs[:1]
    if len(xs) == 1:
        return xs[0]

    lead = xs[0].shape[:d]
    trail = xs[0].shape[d + 1:]
    outer = math.prod(lead)
    inner = math.prod(trail)
    sizes = [int(x.shape[d]) for x in xs]
    c_total = sum(sizes)
    itemsize = jnp.dtype(dtype).itemsize

    if outer == 0 or inner == 0 or c_total == 0:
        # Degenerate empty result: nothing to move.
        return jnp.concatenate(xs, axis=d)

    vmem_limit = _vmem_limit_bytes()
    block_budget = (_block_budget_bytes if _block_budget_bytes is not None
                    else vmem_limit // 8)      # per-step output-block bytes
    row_bytes = c_total * inner * itemsize

    if row_bytes <= block_budget:
        # ---- Flat 2-D path: concat offsets on the lane axis. ----
        xs_flat = [x.reshape(outer, c * inner) for x, c in zip(xs, sizes)]
        to = _pick_outer_tile(outer, row_bytes, block_budget)
        grid = (pl.cdiv(outer, to),)
        in_specs = [pl.BlockSpec((to, c * inner), lambda n: (n, 0)) for c in sizes]
        out_spec = pl.BlockSpec((to, c_total * inner), lambda n: (n, 0))
        out_shape = jax.ShapeDtypeStruct((outer, c_total * inner), dtype)
        dims_sem = ("parallel",)
    else:
        # ---- Tiled 3-D path (huge rows): tile the lane-dense inner axis. ----
        xs_flat = [x.reshape(outer, c, inner) for x, c in zip(xs, sizes)]
        if inner >= 128:
            ti = _round_down(block_budget // max(c_total * itemsize, 1), 128)
            ti = max(128, min(ti, _round_down(inner, 128)))
        else:
            ti = inner
        grid = (outer, pl.cdiv(inner, ti))
        in_specs = [pl.BlockSpec((1, c, ti), lambda n, j: (n, 0, j)) for c in sizes]
        out_spec = pl.BlockSpec((1, c_total, ti), lambda n, j: (n, 0, j))
        out_shape = jax.ShapeDtypeStruct((outer, c_total, inner), dtype)
        dims_sem = ("parallel", "parallel")

    out_flat = pl.pallas_call(
        _concat_kernel,
        out_shape=out_shape,
        grid=grid,
        in_specs=in_specs,
        out_specs=out_spec,
        compiler_params=pltpu.CompilerParams(
            dimension_semantics=dims_sem,
            vmem_limit_bytes=vmem_limit,
        ),
    )(*xs_flat)

    return out_flat.reshape(*lead, c_total, *trail)


if __name__ == "__main__":
    key = jax.random.PRNGKey(0)
    keys = jax.random.split(key, 8)

    # 1) YOLO-style NCHW concat along dim=1, lane-dense inner (H*W = 256).
    N, H, W = 2, 16, 16
    a0 = jax.random.normal(keys[0], (N, 4, H, W), dtype=jnp.float32)
    a1 = jax.random.normal(keys[1], (N, 6, H, W), dtype=jnp.float32)
    a2 = jax.random.normal(keys[2], (N, 2, H, W), dtype=jnp.float32)
    out = jax.block_until_ready(concat([a0, a1, a2], dimension=1))
    ref = jnp.concatenate([a0, a1, a2], axis=1)
    assert out.shape == ref.shape and out.dtype == ref.dtype
    assert bool(jnp.array_equal(out, ref)), "mismatch (case 1)"

    # 2) bf16 with sublane-misaligned channel counts (flat path keeps writes
    #    lane-aligned at multiples of inner = 256).
    b0 = jax.random.normal(keys[3], (N, 3, H, W), dtype=jnp.bfloat16)
    b1 = jax.random.normal(keys[4], (N, 5, H, W), dtype=jnp.bfloat16)
    out = jax.block_until_ready(concat([b0, b1], dimension=1))
    ref = jnp.concatenate([b0, b1], axis=1)
    assert out.shape == ref.shape and out.dtype == ref.dtype
    assert bool(jnp.array_equal(out, ref)), "mismatch (case 2)"

    # 3) Last-axis concat (inner == 1 canonicalizes to a pure lane concat).
    c0 = jax.random.normal(keys[5], (2, 8, 5), dtype=jnp.float32)
    c1 = jax.random.normal(keys[6], (2, 8, 7), dtype=jnp.float32)
    out = jax.block_until_ready(concat([c0, c1], dimension=-1))
    ref = jnp.concatenate([c0, c1], axis=-1)
    assert out.shape == ref.shape and out.dtype == ref.dtype
    assert bool(jnp.array_equal(out, ref)), "mismatch (case 3)"

    # 4) Force the tiled 3-D path (tiny budget) with a ragged inner axis
    #    (H*W = 13*16 = 208 -> one 128-lane tile + one masked tail block).
    d0 = jax.random.normal(keys[7], (2, 4, 13, 16), dtype=jnp.float32)
    d1 = jax.random.normal(keys[0], (2, 6, 13, 16), dtype=jnp.float32)
    out = jax.block_until_ready(
        concat([d0, d1], dimension=1, _block_budget_bytes=4096))
    ref = jnp.concatenate([d0, d1], axis=1)
    assert out.shape == ref.shape and out.dtype == ref.dtype
    assert bool(jnp.array_equal(out, ref)), "mismatch (case 4)"

    print("KERNEL_OK")
</pallas_src>

<mosaic_0001>
module attributes {stable_mosaic.version = 11 : i64} {
  func.func @_concat_kernel(%arg0: i32, %arg1: memref<2x1024xf32, #tpu.memory_space<vmem>>, %arg2: memref<2x1536xf32, #tpu.memory_space<vmem>>, %arg3: memref<2x512xf32, #tpu.memory_space<vmem>>, %arg4: memref<2x3072xf32, #tpu.memory_space<vmem>>) attributes {dimension_semantics = [#tpu.dimension_semantics<parallel>], iteration_bounds = array<i64: 1>, scalar_prefetch = 0 : i64, scratch_operands = 0 : i64, tpu.core_type = #tpu.core_type<tc>, window_params = [{transform_indices = @transform_0, window_bounds = array<i64: 2, 1024>}, {transform_indices = @transform_1, window_bounds = array<i64: 2, 1536>}, {transform_indices = @transform_2, window_bounds = array<i64: 2, 512>}, {transform_indices = @transform_3, window_bounds = array<i64: 2, 3072>}]} {
    %c0 = arith.constant 0 : index
    %c0_0 = arith.constant 0 : index
    %0 = vector.load %arg1[%c0, %c0_0] : memref<2x1024xf32, #tpu.memory_space<vmem>>, vector<2x1024xf32>
    %c0_1 = arith.constant 0 : index
    %c0_2 = arith.constant 0 : index
    %1 = vector.load %arg4[%c0_1, %c0_2] : memref<2x3072xf32, #tpu.memory_space<vmem>>, vector<2x1024xf32>
    tpu.vector_store %arg4[%c0_1, %c0_2], %0 {strides = array<i32>} : memref<2x3072xf32, #tpu.memory_space<vmem>>, vector<2x1024xf32>,
    %c0_3 = arith.constant 0 : index
    %c0_4 = arith.constant 0 : index
    %2 = vector.load %arg2[%c0_3, %c0_4] : memref<2x1536xf32, #tpu.memory_space<vmem>>, vector<2x1536xf32>
    %c0_5 = arith.constant 0 : index
    %c1024 = arith.constant 1024 : index
    %3 = vector.load %arg4[%c0_5, %c1024] : memref<2x3072xf32, #tpu.memory_space<vmem>>, vector<2x1536xf32>
    tpu.vector_store %arg4[%c0_5, %c1024], %2 {strides = array<i32>} : memref<2x3072xf32, #tpu.memory_space<vmem>>, vector<2x1536xf32>,
    %c0_6 = arith.constant 0 : index
    %c0_7 = arith.constant 0 : index
    %4 = vector.load %arg3[%c0_6, %c0_7] : memref<2x512xf32, #tpu.memory_space<vmem>>, vector<2x512xf32>
    %c0_8 = arith.constant 0 : index
    %c2560 = arith.constant 2560 : index
    %5 = vector.load %arg4[%c0_8, %c2560] : memref<2x3072xf32, #tpu.memory_space<vmem>>, vector<2x512xf32>
    tpu.vector_store %arg4[%c0_8, %c2560], %4 {strides = array<i32>} : memref<2x3072xf32, #tpu.memory_space<vmem>>, vector<2x512xf32>,
    return
  }
  func.func @transform_0(%arg0: i32) -> (i32, i32) {
    %c0_i32 = arith.constant 0 : i32
    %c0_i32_0 = arith.constant 0 : i32
    return %arg0, %c0_i32 : i32, i32
  }
  func.func @transform_1(%arg0: i32) -> (i32, i32) {
    %c0_i32 = arith.constant 0 : i32
    %c0_i32_0 = arith.constant 0 : i32
    return %arg0, %c0_i32 : i32, i32
  }
  func.func @transform_2(%arg0: i32) -> (i32, i32) {
    %c0_i32 = arith.constant 0 : i32
    %c0_i32_0 = arith.constant 0 : i32
    return %arg0, %c0_i32 : i32, i32
  }
  func.func @transform_3(%arg0: i32) -> (i32, i32) {
    %c0_i32 = arith.constant 0 : i32
    %c0_i32_0 = arith.constant 0 : i32
    return %arg0, %c0_i32 : i32, i32
  }
}

</mosaic_0001>

<bundles_post_ra>
// kernel: tpu_custom_call.1
= control target key start
LH: loop header
LB: loop body
LE: loop exit
PB: predicated region body
PF: predicated region fallthrough
CT: control target
= control target key end

     0   :  { %8 = vsyncpa [#allocation3], 0  ;;  %s248_s0 = inlined_call_operand.hbm [shape: f32[2,1024], index: 0, kind: input, shape index: {}]   ;;  %s249_s1 = inlined_call_operand.hbm [shape: f32[2,1536], index: 1, kind: input, shape index: {}]   ;;  %s250_s2 = inlined_call_operand.hbm [shape: f32[2,512], index: 2, kind: input, shape index: {}]   ;;  %s251_s3 = inlined_call_operand.hbm [shape: f32[2,3072], index: 3, kind: output, shape index: {}]  }
   0x1   :  { %9 = vsyncpa [#allocation6], 0 }
   0x2   :  { %10 = vsyncpa [#allocation4], 0  ;;  %s176_s12 = smov [#allocation5]   ;;  %s177_s14 = smov [#allocation2]  }
   0x3   :  { %s27_s13 = sshll.u32 %s176_s12, 4  ;;  %s17_s15 = sshll.u32 %s177_s14, 4  ;;  %s28_s13 = int_to_ptr.vmem [resolvable:$true] %s27_s13  ;;  %s18_s15 = int_to_ptr.vmem [resolvable:$true] %s17_s15 }
   0x4   :  { %s82_s18 = scalar_lea.hbm %s249_s1, 384 }
   0x5   :  { %p83_p0 = scmp.ne.s32.totalorder %s249_s1, %s82_s18  ;;  %p86_p1 = scmp.lt.u32.totalorder %s82_s18, %s249_s1 }
   0x7   :  { %p88_p2 = pnand %p86_p1, %p83_p0 }
   0x9   :  { %91 = shalt.err (!%p88_p2)
}
   0xa   :  { %s92_s23 = scalar_lea.vmem %s28_s13, 384  ;;  %p97_p4 = scmp.lt.s32.totalorder %s28_s13, %s28_s13 }
   0xb   :  { %p93_p3 = scmp.ne.s32.totalorder %s28_s13, %s92_s23  ;;  %p98_p5 = scmp.lt.s32.totalorder %s92_s23, %s92_s23 }
   0xd   :  { %p99_p6 = por %p98_p5, %p97_p4 }
   0xf   :  { %p100_p7 = pnand %p99_p6, %p93_p3 }
  0x11   :  { %103 = shalt.err (!%p100_p7)
}
  0x12   :  { %30 = dma.hbm_to_vmem [thread:$0]  %s249_s1, 384, %s28_s13, [#allocation6]  }
  0x13   :  { %s104_s28 = scalar_lea.hbm %s248_s0, 256 }
  0x14   :  { %p105_p8 = scmp.ne.s32.totalorder %s248_s0, %s104_s28  ;;  %p108_p9 = scmp.lt.u32.totalorder %s104_s28, %s248_s0 }
  0x16   :  { %p110_p10 = pnand %p108_p9, %p105_p8 }
  0x18   :  { %113 = shalt.err (!%p110_p10)
}
  0x19   :  { %s114_s6 = scalar_lea.vmem %s18_s15, 256  ;;  %p119_p12 = scmp.lt.s32.totalorder %s18_s15, %s18_s15 }
  0x1a   :  { %p115_p11 = scmp.ne.s32.totalorder %s18_s15, %s114_s6  ;;  %p120_p13 = scmp.lt.s32.totalorder %s114_s6, %s114_s6 }
  0x1c   :  { %p121_p0 = por %p120_p13, %p119_p12 }
  0x1e   :  { %p122_p1 = pnand %p121_p0, %p115_p11 }
  0x20   :  { %125 = shalt.err (!%p122_p1)
}
  0x21   :  { %20 = dma.hbm_to_vmem [thread:$0]  %s248_s0, 256, %s18_s15, [#allocation3]  }
  0x22   :  { %s178_s8 = smov [#allocation7]   ;;  %s126_s12 = scalar_lea.hbm %s250_s2, 128 }
  0x23   :  { %s37_s9 = sshll.u32 %s178_s8, 4  ;;  %p127_p2 = scmp.ne.s32.totalorder %s250_s2, %s126_s12  ;;  %s38_s9 = int_to_ptr.vmem [resolvable:$true] %s37_s9 }
  0x24   :  { %p130_p3 = scmp.lt.u32.totalorder %s126_s12, %s250_s2 }
  0x26   :  { %p132_p4 = pnand %p130_p3, %p127_p2 }
  0x28   :  { %135 = shalt.err (!%p132_p4)
}
  0x29   :  { %s136_s18 = scalar_lea.vmem %s38_s9, 128  ;;  %p141_p6 = scmp.lt.s32.totalorder %s38_s9, %s38_s9 }
  0x2a   :  { %p137_p5 = scmp.ne.s32.totalorder %s38_s9, %s136_s18  ;;  %p142_p7 = scmp.lt.s32.totalorder %s136_s18, %s136_s18 }
  0x2c   :  { %p143_p8 = por %p142_p7, %p141_p6 }
  0x2e   :  { %p144_p9 = pnand %p143_p8, %p137_p5 }
  0x30   :  { %147 = shalt.err (!%p144_p9)
}
  0x31   :  { %40 = dma.hbm_to_vmem [thread:$0]  %s250_s2, 128, %s38_s9, [#allocation6]  }
  0x32   :  { %170 = dma.done.wait [#allocation3], 256  }
  0x33   :  { %171 = vsyncadd [#allocation3], 4294967040 }
  0x34   :  { %172 = dma.done.wait [#allocation6], 512  }
  0x35   :  { %173 = vsyncadd [#allocation6], 4294966784  ;;  %s179_s19 = smov [#allocation8]   ;;  %v50_v0 = vld [vmem:[#allocation2] sm:$0xff]  ;;  %v51_v1 = vld [vmem:[#allocation2 + $0x8] sm:$0xff] }
  0x36   :  { %s68_s20 = sshll.u32 %s179_s19, 4  ;;  %v54_v2 = vld [vmem:[#allocation5] sm:$0xff]  ;;  %52 = vst [vmem:[#allocation8] sm:$0xff] %v50_v0  ;;  %53 = vst [vmem:[#allocation8 + $0x8] sm:$0xff] %v51_v1  ;;  %v55_v3 = vld [vmem:[#allocation5 + $0x8] sm:$0xff]  ;;  %s69_s20 = int_to_ptr.vmem [resolvable:$true] %s68_s20 }
  0x37   :  { %57 = vst [vmem:[#allocation8 + $0x10] sm:$0xff] %v54_v2  ;;  %v56_v4 = vld [vmem:[#allocation5 + $0x10] sm:$0xff]  ;;  %v60_v5 = vld [vmem:[#allocation7] sm:$0xff]  ;;  %58 = vst [vmem:[#allocation8 + $0x18] sm:$0xff] %v55_v3  ;;  %s148_s2 = scalar_lea.vmem %s69_s20, 768  ;;  %p153_p11 = scmp.lt.s32.totalorder %s69_s20, %s69_s20 }
  0x38   :  { %59 = vst [vmem:[#allocation8 + $0x20] sm:$0xff] %v56_v4  ;;  %61 = vst [vmem:[#allocation8 + $0x28] sm:$0xff] %v60_v5  ;;  %p149_p10 = scmp.ne.s32.totalorder %s69_s20, %s148_s2  ;;  %p154_p12 = scmp.lt.s32.totalorder %s148_s2, %s148_s2 }
  0x3a   :  { %p155_p13 = por %p154_p12, %p153_p11 }
  0x3c   :  { %p156_p0 = pnand %p155_p13, %p149_p10 }
  0x3e   :  { %159 = shalt.err (!%p156_p0)
}
  0x3f   :  { %s160_s23 = scalar_lea.hbm %s251_s3, 768 }
  0x40   :  { %p161_p1 = scmp.ne.s32.totalorder %s251_s3, %s160_s23  ;;  %p164_p2 = scmp.lt.u32.totalorder %s160_s23, %s251_s3 }
  0x42   :  { %p166_p3 = pnand %p164_p2, %p161_p1 }
  0x44   :  { %169 = shalt.err (!%p166_p3)
}
  0x45   :  { %71 = dma.vmem_to_hbm [thread:$0]  %s69_s20, 768, %s251_s3, [#allocation4]  }
  0x46   :  { %174 = dma.done.wait [#allocation4], 768  }
  0x47   :  { %175 = vsyncadd [#allocation4], 4294966528 }
  0x48   :  { %75 = vsyncpa [#allocation3], 1 }
  0x49   :  { %76 = vsyncpa [#allocation6], 1 }
  0x4a   :  { %77 = vsyncpa [#allocation4], 1 }

</bundles_post_ra>
